<compile_context>
chip_gen: v7x
topology: tpu7x:2x2x1
jax: 0.10.0
libtpu: 0.0.40
codegen_flags: <defaults>
</compile_context>

<pallas_src>
import functools

import jax
import jax.numpy as jnp
from jax.experimental import pallas as pl
from jax.experimental.pallas import tpu as pltpu


def _act_classifier_kernel(
    x_ref,        # (T*B, nx)     all time steps, rows ordered t*B + b
    wih_ref,      # (nx, 4*nh)    LSTM input->gates (transposed, PyTorch order i,f,g,o)
    whh_ref,      # (nh, 4*nh)    LSTM hidden->gates (transposed)
    bg_ref,       # (1, 4*nh)     b_ih + b_hh
    w1_ref,       # (nh, h1)      MLP layer 1 (transposed)
    b1_ref,       # (1, h1)
    w2_ref,       # (h1, h2)      MLP layer 2 (transposed)
    b2_ref,       # (1, h2)
    wo_ref,       # (h2, na_pad)  d_out (transposed, zero-padded columns)
    bo_ref,       # (1, na_pad)   d_out bias (-1e30 in padded lanes)
    y_ref,        # (T*B, na_pad) output probabilities (lane-dense slab)
    *, T, B,
):
    nh = whh_ref.shape[0]
    whh = whh_ref[...]

    # ---- Hoisted input projection: one (T*B,nx)x(nx,4nh) matmul (perf #1) ----
    gates_x = (
        jnp.dot(x_ref[...], wih_ref[...], preferred_element_type=jnp.float32)
        + bg_ref[...]
    )                                                        # (T*B, 4nh)

    # ---- LSTMCell recurrence (PyTorch gate order i, f, g, o) ----
    # T is small & static -> fully unrolled; (h, c) and every h_t stay in vregs.
    # TODO(synk): weight-stationary whh via pltpu.matmul_push_rhs/acc_lhs/pop would
    # shave the remaining per-step MXU RHS-push latency; skipped at these toy shapes.
    h = jnp.zeros((B, nh), jnp.float32)
    c = jnp.zeros((B, nh), jnp.float32)
    hs = []
    for t in range(T):
        gates = gates_x[t * B:(t + 1) * B, :] + jnp.dot(
            h, whh, preferred_element_type=jnp.float32)      # (B, 4nh)
        # 3 EUP passes per step (perf #3):
        #   sigmoid(v) = 0.5*tanh(0.5*v) + 0.5 for i/f/o, one tanh for g, tanh(c).
        s = jnp.tanh(0.5 * gates)
        i_g = 0.5 * s[:, 0 * nh:1 * nh] + 0.5
        f_g = 0.5 * s[:, 1 * nh:2 * nh] + 0.5
        o_g = 0.5 * s[:, 3 * nh:4 * nh] + 0.5
        g_g = jnp.tanh(gates[:, 2 * nh:3 * nh])
        c = f_g * c + i_g * g_g
        h = o_g * jnp.tanh(c)
        hs.append(h)                                         # stays in registers

    # ---- Batched feed-forward over all T*B rows (bulk of the FLOPs) ----
    # (T*B, nh) is ~2 KiB: pure vreg data, no VMEM bounce (perf #2).
    h_all = jnp.concatenate(hs, axis=0)                      # (T*B, nh)
    # TODO(synk): bf16 MXU operands (review #4) deferred — latency-bound recurrence
    # gains little and LSTM error accumulation risks the 2e-3 f32-reference match.
    z = jnp.tanh(jnp.dot(h_all, w1_ref[...], preferred_element_type=jnp.float32) + b1_ref[...])
    z = jnp.tanh(jnp.dot(z, w2_ref[...], preferred_element_type=jnp.float32) + b2_ref[...])

    logits = jnp.dot(z, wo_ref[...], preferred_element_type=jnp.float32) + bo_ref[...]
    # No max-shift needed (perf #7): |z| <= 1 and head weights are small, so the
    # real logits are bounded; padded lanes carry bias -1e30 -> exp == 0 exactly.
    e = jnp.exp(logits)
    # Exact normalization (correctness fix): every output row sums to 1.
    y_ref[...] = e / jnp.sum(e, axis=-1, keepdims=True)


def act_conti_classifier_forward(x, params, n_action):
    """x: (T, B, nx) f32. Returns (T, B, n_action) f32 softmax probabilities."""
    T, B, nx = x.shape
    wih, whh, bg, w1, b1, w2, b2, wo_p, bo_p = params
    nh = whh.shape[0]
    h1 = w1.shape[1]
    h2 = w2.shape[1]
    na_pad = wo_p.shape[1]
    tb = T * B

    x2 = x.reshape(tb, nx)  # rows ordered t*B + b

    full2 = lambda i: (0, 0)

    flops = 2 * tb * ((nx + nh) * 4 * nh + nh * h1 + h1 * h2 + h2 * na_pad)
    transcendentals = tb * (6 * nh + h1 + h2 + na_pad)
    bytes_accessed = 4 * (
        x2.size + wih.size + whh.size + bg.size + w1.size + b1.size
        + w2.size + b2.size + wo_p.size + bo_p.size + tb * na_pad
    )

    grid_spec = pltpu.PrefetchScalarGridSpec(
        num_scalar_prefetch=0,
        grid=(1,),
        in_specs=[
            pl.BlockSpec((tb, nx), full2),
            pl.BlockSpec((nx, 4 * nh), full2),
            pl.BlockSpec((nh, 4 * nh), full2),
            pl.BlockSpec((1, 4 * nh), full2),
            pl.BlockSpec((nh, h1), full2),
            pl.BlockSpec((1, h1), full2),
            pl.BlockSpec((h1, h2), full2),
            pl.BlockSpec((1, h2), full2),
            pl.BlockSpec((h2, na_pad), full2),
            pl.BlockSpec((1, na_pad), full2),
        ],
        out_specs=pl.BlockSpec((tb, na_pad), full2),
    )

    # TODO(synk): on v7x, once tb / hidden sizes grow, split the batched FF phase
    # over a leading "parallel" grid axis (8-row tiles, lane-dense na_pad) to use
    # both TensorCores and re-derive tiling against the 64 MiB VMEM; at these
    # KB-scale shapes the single-block, single-TC design is the right call.
    y_pad = pl.pallas_call(
        functools.partial(_act_classifier_kernel, T=T, B=B),
        out_shape=jax.ShapeDtypeStruct((tb, na_pad), jnp.float32),
        grid_spec=grid_spec,
        compiler_params=pltpu.CompilerParams(
            # single step; the LSTM recurrence is sequential inside the kernel
            dimension_semantics=("arbitrary",),
        ),
        cost_estimate=pl.CostEstimate(
            flops=flops,
            transcendentals=transcendentals,
            bytes_accessed=bytes_accessed,
        ),
    )(x2, wih, whh, bg, w1, b1, w2, b2, wo_p, bo_p)

    return y_pad[:, :n_action].reshape(T, B, n_action)


def _init_params(key, nx, nh, nh_mlp, n_action):
    """Deterministic PyTorch-style uniform(-1/sqrt(fan_in), 1/sqrt(fan_in)) init,
    returned directly in the kernel's layout (transposed weights, folded LSTM
    biases, 128-lane padded output head — perf #6)."""
    keys = jax.random.split(key, 10)
    k = iter(keys)

    def uni(key, shape, fan_in):
        bound = 1.0 / jnp.sqrt(jnp.float32(fan_in))
        return jax.random.uniform(key, shape, jnp.float32, -bound, bound)

    # LSTMCell: weight_ih (4nh, nx), weight_hh (4nh, nh), bias_ih, bias_hh (fan = nh)
    w_ih = uni(next(k), (4 * nh, nx), nh)
    w_hh = uni(next(k), (4 * nh, nh), nh)
    b_ih = uni(next(k), (4 * nh,), nh)
    b_hh = uni(next(k), (4 * nh,), nh)

    h1, h2 = nh_mlp
    w1 = uni(next(k), (h1, nh), nh)
    b1 = uni(next(k), (h1,), nh)
    w2 = uni(next(k), (h2, h1), h1)
    b2 = uni(next(k), (h2,), h1)
    wo = uni(next(k), (n_action, h2), h2)
    bo = uni(next(k), (n_action,), h2)

    # Pad the action dim to a full 128-lane tile once, here, so the kernel's
    # output store is lane-dense (unmasked vst); pad lanes get bias -1e30 so
    # they softmax to exactly 0 and the wrapper just slices them off.
    na_pad = ((n_action + 127) // 128) * 128
    wo_p = jnp.zeros((h2, na_pad), jnp.float32).at[:, :n_action].set(wo.T)
    bo_p = jnp.full((1, na_pad), -1e30, jnp.float32).at[:, :n_action].set(bo)

    return (
        w_ih.T,                                  # (nx, 4nh)
        w_hh.T,                                  # (nh, 4nh)
        (b_ih + b_hh).reshape(1, 4 * nh),        # (1, 4nh)
        w1.T, b1.reshape(1, h1),
        w2.T, b2.reshape(1, h2),
        wo_p, bo_p,                              # (h2, 128), (1, 128)
    )


def _reference_forward(x, params, n_action):
    """Pure-JAX reference of the PyTorch forward (sanity check)."""
    wih, whh, bg, w1, b1, w2, b2, wo_p, bo_p = params
    wo = wo_p[:, :n_action]
    bo = bo_p[:, :n_action]
    T, B, nx = x.shape
    nh = whh.shape[0]
    h = jnp.zeros((B, nh), jnp.float32)
    c = jnp.zeros((B, nh), jnp.float32)
    outs = []
    for t in range(T):
        gates = x[t] @ wih + h @ whh + bg
        i_g = jax.nn.sigmoid(gates[:, 0 * nh:1 * nh])
        f_g = jax.nn.sigmoid(gates[:, 1 * nh:2 * nh])
        g_g = jnp.tanh(gates[:, 2 * nh:3 * nh])
        o_g = jax.nn.sigmoid(gates[:, 3 * nh:4 * nh])
        c = f_g * c + i_g * g_g
        h = o_g * jnp.tanh(c)
        z = jnp.tanh(h @ w1 + b1)
        z = jnp.tanh(z @ w2 + b2)
        outs.append(jax.nn.softmax(z @ wo + bo, axis=-1))
    return jnp.stack(outs)


if __name__ == "__main__":
    # Small shapes consistent with the module (nx features per pose, LSTM hidden,
    # 2-layer MLP, n_action classes; hori = horizon + t_his time steps).
    B = 2
    nx = 16
    nh_rnn = 32
    nh_mlp = (64, 48)
    n_action = 15
    horizon = 5
    t_his = 3
    hori = horizon + t_his

    key = jax.random.PRNGKey(0)
    kx, kp = jax.random.split(key)
    x = jax.random.normal(kx, (hori, B, nx), jnp.float32)
    params = _init_params(kp, nx, nh_rnn, nh_mlp, n_action)

    y = jax.block_until_ready(act_conti_classifier_forward(x, params, n_action))
    y_ref = jax.block_until_ready(_reference_forward(x, params, n_action))

    assert y.shape == (hori, B, n_action)
    assert jnp.allclose(y, y_ref, atol=2e-3, rtol=2e-3)
    # rows of y are softmax distributions (exact in-kernel normalization)
    assert jnp.allclose(jnp.sum(y, axis=-1), 1.0, atol=1e-4)

    print("KERNEL_OK")
</pallas_src>

<mosaic_0001>
module attributes {stable_mosaic.version = 11 : i64} {
  func.func @_act_classifier_kernel(%arg0: i32, %arg1: memref<16x16xf32, #tpu.memory_space<vmem>>, %arg2: memref<16x128xf32, #tpu.memory_space<vmem>>, %arg3: memref<32x128xf32, #tpu.memory_space<vmem>>, %arg4: memref<1x128xf32, #tpu.memory_space<vmem>>, %arg5: memref<32x64xf32, #tpu.memory_space<vmem>>, %arg6: memref<1x64xf32, #tpu.memory_space<vmem>>, %arg7: memref<64x48xf32, #tpu.memory_space<vmem>>, %arg8: memref<1x48xf32, #tpu.memory_space<vmem>>, %arg9: memref<48x128xf32, #tpu.memory_space<vmem>>, %arg10: memref<1x128xf32, #tpu.memory_space<vmem>>, %arg11: memref<16x128xf32, #tpu.memory_space<vmem>>) attributes {dimension_semantics = [#tpu.dimension_semantics<arbitrary>], iteration_bounds = array<i64: 1>, scalar_prefetch = 0 : i64, scratch_operands = 0 : i64, tpu.core_type = #tpu.core_type<tc>, window_params = [{pipeline_mode = #tpu.pipeline_mode<synchronous>, transform_indices = @transform_0, window_bounds = array<i64: 16, 16>}, {pipeline_mode = #tpu.pipeline_mode<synchronous>, transform_indices = @transform_1, window_bounds = array<i64: 16, 128>}, {pipeline_mode = #tpu.pipeline_mode<synchronous>, transform_indices = @transform_2, window_bounds = array<i64: 32, 128>}, {pipeline_mode = #tpu.pipeline_mode<synchronous>, transform_indices = @transform_3, window_bounds = array<i64: 1, 128>}, {pipeline_mode = #tpu.pipeline_mode<synchronous>, transform_indices = @transform_4, window_bounds = array<i64: 32, 64>}, {pipeline_mode = #tpu.pipeline_mode<synchronous>, transform_indices = @transform_5, window_bounds = array<i64: 1, 64>}, {pipeline_mode = #tpu.pipeline_mode<synchronous>, transform_indices = @transform_6, window_bounds = array<i64: 64, 48>}, {pipeline_mode = #tpu.pipeline_mode<synchronous>, transform_indices = @transform_7, window_bounds = array<i64: 1, 48>}, {pipeline_mode = #tpu.pipeline_mode<synchronous>, transform_indices = @transform_8, window_bounds = array<i64: 48, 128>}, {pipeline_mode = #tpu.pipeline_mode<synchronous>, transform_indices = @transform_9, window_bounds = array<i64: 1, 128>}, {pipeline_mode = #tpu.pipeline_mode<synchronous>, transform_indices = @transform_10, window_bounds = array<i64: 16, 128>}]} {
    %c0 = arith.constant 0 : index
    %c0_0 = arith.constant 0 : index
    %0 = vector.load %arg3[%c0, %c0_0] : memref<32x128xf32, #tpu.memory_space<vmem>>, vector<32x128xf32>
    %c0_1 = arith.constant 0 : index
    %c0_2 = arith.constant 0 : index
    %1 = vector.load %arg1[%c0_1, %c0_2] : memref<16x16xf32, #tpu.memory_space<vmem>>, vector<16x16xf32>
    %c0_3 = arith.constant 0 : index
    %c0_4 = arith.constant 0 : index
    %2 = vector.load %arg2[%c0_3, %c0_4] : memref<16x128xf32, #tpu.memory_space<vmem>>, vector<16x128xf32>
    %cst = arith.constant dense<0.000000e+00> : vector<16x128xf32>
    %3 = tpu.matmul %1, %2, %cst {dimension_numbers = #tpu.dot_dimension_numbers<[1], [0], [0], [1], [0, 0, 1, 1], [], []>} : vector<16x16xf32>, vector<16x128xf32>, vector<16x128xf32> -> vector<16x128xf32>
    %c0_5 = arith.constant 0 : index
    %c0_6 = arith.constant 0 : index
    %4 = vector.load %arg4[%c0_5, %c0_6] : memref<1x128xf32, #tpu.memory_space<vmem>>, vector<1x128xf32>
    %5 = vector.broadcast %4 : vector<1x128xf32> to vector<16x128xf32>
    %6 = arith.addf %3, %5 : vector<16x128xf32>
    %cst_7 = arith.constant 0.000000e+00 : f32
    %7 = vector.broadcast %cst_7 : f32 to vector<2x32xf32>
    %cst_8 = arith.constant 0.000000e+00 : f32
    %8 = vector.broadcast %cst_8 : f32 to vector<2x32xf32>
    %9 = vector.extract_strided_slice %6 {offsets = [0, 0], sizes = [2, 128], strides = [1, 1]} : vector<16x128xf32> to vector<2x128xf32>
    %cst_9 = arith.constant dense<0.000000e+00> : vector<2x128xf32>
    %10 = tpu.matmul %7, %0, %cst_9 {dimension_numbers = #tpu.dot_dimension_numbers<[1], [0], [0], [1], [0, 0, 1, 1], [], []>} : vector<2x32xf32>, vector<32x128xf32>, vector<2x128xf32> -> vector<2x128xf32>
    %11 = arith.addf %9, %10 : vector<2x128xf32>
    %cst_10 = arith.constant 5.000000e-01 : f32
    %12 = vector.broadcast %cst_10 : f32 to vector<2x128xf32>
    %13 = arith.mulf %12, %11 : vector<2x128xf32>
    %14 = math.tanh %13 : vector<2x128xf32>
    %15 = vector.extract_strided_slice %14 {offsets = [0, 0], sizes = [2, 32], strides = [1, 1]} : vector<2x128xf32> to vector<2x32xf32>
    %cst_11 = arith.constant 5.000000e-01 : f32
    %16 = vector.broadcast %cst_11 : f32 to vector<2x32xf32>
    %17 = arith.mulf %16, %15 : vector<2x32xf32>
    %cst_12 = arith.constant 5.000000e-01 : f32
    %18 = vector.broadcast %cst_12 : f32 to vector<2x32xf32>
    %19 = arith.addf %17, %18 : vector<2x32xf32>
    %20 = vector.extract_strided_slice %14 {offsets = [0, 32], sizes = [2, 32], strides = [1, 1]} : vector<2x128xf32> to vector<2x32xf32>
    %cst_13 = arith.constant 5.000000e-01 : f32
    %21 = vector.broadcast %cst_13 : f32 to vector<2x32xf32>
    %22 = arith.mulf %21, %20 : vector<2x32xf32>
    %cst_14 = arith.constant 5.000000e-01 : f32
    %23 = vector.broadcast %cst_14 : f32 to vector<2x32xf32>
    %24 = arith.addf %22, %23 : vector<2x32xf32>
    %25 = vector.extract_strided_slice %14 {offsets = [0, 96], sizes = [2, 32], strides = [1, 1]} : vector<2x128xf32> to vector<2x32xf32>
    %cst_15 = arith.constant 5.000000e-01 : f32
    %26 = vector.broadcast %cst_15 : f32 to vector<2x32xf32>
    %27 = arith.mulf %26, %25 : vector<2x32xf32>
    %cst_16 = arith.constant 5.000000e-01 : f32
    %28 = vector.broadcast %cst_16 : f32 to vector<2x32xf32>
    %29 = arith.addf %27, %28 : vector<2x32xf32>
    %30 = vector.extract_strided_slice %11 {offsets = [0, 64], sizes = [2, 32], strides = [1, 1]} : vector<2x128xf32> to vector<2x32xf32>
    %31 = math.tanh %30 : vector<2x32xf32>
    %32 = arith.mulf %24, %8 : vector<2x32xf32>
    %33 = arith.mulf %19, %31 : vector<2x32xf32>
    %34 = arith.addf %32, %33 : vector<2x32xf32>
    %35 = math.tanh %34 : vector<2x32xf32>
    %36 = arith.mulf %29, %35 : vector<2x32xf32>
    %37 = vector.extract_strided_slice %6 {offsets = [2, 0], sizes = [2, 128], strides = [1, 1]} : vector<16x128xf32> to vector<2x128xf32>
    %cst_17 = arith.constant dense<0.000000e+00> : vector<2x128xf32>
    %38 = tpu.matmul %36, %0, %cst_17 {dimension_numbers = #tpu.dot_dimension_numbers<[1], [0], [0], [1], [0, 0, 1, 1], [], []>} : vector<2x32xf32>, vector<32x128xf32>, vector<2x128xf32> -> vector<2x128xf32>
    %39 = arith.addf %37, %38 : vector<2x128xf32>
    %cst_18 = arith.constant 5.000000e-01 : f32
    %40 = vector.broadcast %cst_18 : f32 to vector<2x128xf32>
    %41 = arith.mulf %40, %39 : vector<2x128xf32>
    %42 = math.tanh %41 : vector<2x128xf32>
    %43 = vector.extract_strided_slice %42 {offsets = [0, 0], sizes = [2, 32], strides = [1, 1]} : vector<2x128xf32> to vector<2x32xf32>
    %cst_19 = arith.constant 5.000000e-01 : f32
    %44 = vector.broadcast %cst_19 : f32 to vector<2x32xf32>
    %45 = arith.mulf %44, %43 : vector<2x32xf32>
    %cst_20 = arith.constant 5.000000e-01 : f32
    %46 = vector.broadcast %cst_20 : f32 to vector<2x32xf32>
    %47 = arith.addf %45, %46 : vector<2x32xf32>
    %48 = vector.extract_strided_slice %42 {offsets = [0, 32], sizes = [2, 32], strides = [1, 1]} : vector<2x128xf32> to vector<2x32xf32>
    %cst_21 = arith.constant 5.000000e-01 : f32
    %49 = vector.broadcast %cst_21 : f32 to vector<2x32xf32>
    %50 = arith.mulf %49, %48 : vector<2x32xf32>
    %cst_22 = arith.constant 5.000000e-01 : f32
    %51 = vector.broadcast %cst_22 : f32 to vector<2x32xf32>
    %52 = arith.addf %50, %51 : vector<2x32xf32>
    %53 = vector.extract_strided_slice %42 {offsets = [0, 96], sizes = [2, 32], strides = [1, 1]} : vector<2x128xf32> to vector<2x32xf32>
    %cst_23 = arith.constant 5.000000e-01 : f32
    %54 = vector.broadcast %cst_23 : f32 to vector<2x32xf32>
    %55 = arith.mulf %54, %53 : vector<2x32xf32>
    %cst_24 = arith.constant 5.000000e-01 : f32
    %56 = vector.broadcast %cst_24 : f32 to vector<2x32xf32>
    %57 = arith.addf %55, %56 : vector<2x32xf32>
    %58 = vector.extract_strided_slice %39 {offsets = [0, 64], sizes = [2, 32], strides = [1, 1]} : vector<2x128xf32> to vector<2x32xf32>
    %59 = math.tanh %58 : vector<2x32xf32>
    %60 = arith.mulf %52, %34 : vector<2x32xf32>
    %61 = arith.mulf %47, %59 : vector<2x32xf32>
    %62 = arith.addf %60, %61 : vector<2x32xf32>
    %63 = math.tanh %62 : vector<2x32xf32>
    %64 = arith.mulf %57, %63 : vector<2x32xf32>
    %65 = vector.extract_strided_slice %6 {offsets = [4, 0], sizes = [2, 128], strides = [1, 1]} : vector<16x128xf32> to vector<2x128xf32>
    %cst_25 = arith.constant dense<0.000000e+00> : vector<2x128xf32>
    %66 = tpu.matmul %64, %0, %cst_25 {dimension_numbers = #tpu.dot_dimension_numbers<[1], [0], [0], [1], [0, 0, 1, 1], [], []>} : vector<2x32xf32>, vector<32x128xf32>, vector<2x128xf32> -> vector<2x128xf32>
    %67 = arith.addf %65, %66 : vector<2x128xf32>
    %cst_26 = arith.constant 5.000000e-01 : f32
    %68 = vector.broadcast %cst_26 : f32 to vector<2x128xf32>
    %69 = arith.mulf %68, %67 : vector<2x128xf32>
    %70 = math.tanh %69 : vector<2x128xf32>
    %71 = vector.extract_strided_slice %70 {offsets = [0, 0], sizes = [2, 32], strides = [1, 1]} : vector<2x128xf32> to vector<2x32xf32>
    %cst_27 = arith.constant 5.000000e-01 : f32
    %72 = vector.broadcast %cst_27 : f32 to vector<2x32xf32>
    %73 = arith.mulf %72, %71 : vector<2x32xf32>
    %cst_28 = arith.constant 5.000000e-01 : f32
    %74 = vector.broadcast %cst_28 : f32 to vector<2x32xf32>
    %75 = arith.addf %73, %74 : vector<2x32xf32>
    %76 = vector.extract_strided_slice %70 {offsets = [0, 32], sizes = [2, 32], strides = [1, 1]} : vector<2x128xf32> to vector<2x32xf32>
    %cst_29 = arith.constant 5.000000e-01 : f32
    %77 = vector.broadcast %cst_29 : f32 to vector<2x32xf32>
    %78 = arith.mulf %77, %76 : vector<2x32xf32>
    %cst_30 = arith.constant 5.000000e-01 : f32
    %79 = vector.broadcast %cst_30 : f32 to vector<2x32xf32>
    %80 = arith.addf %78, %79 : vector<2x32xf32>
    %81 = vector.extract_strided_slice %70 {offsets = [0, 96], sizes = [2, 32], strides = [1, 1]} : vector<2x128xf32> to vector<2x32xf32>
    %cst_31 = arith.constant 5.000000e-01 : f32
    %82 = vector.broadcast %cst_31 : f32 to vector<2x32xf32>
    %83 = arith.mulf %82, %81 : vector<2x32xf32>
    %cst_32 = arith.constant 5.000000e-01 : f32
    %84 = vector.broadcast %cst_32 : f32 to vector<2x32xf32>
    %85 = arith.addf %83, %84 : vector<2x32xf32>
    %86 = vector.extract_strided_slice %67 {offsets = [0, 64], sizes = [2, 32], strides = [1, 1]} : vector<2x128xf32> to vector<2x32xf32>
    %87 = math.tanh %86 : vector<2x32xf32>
    %88 = arith.mulf %80, %62 : vector<2x32xf32>
    %89 = arith.mulf %75, %87 : vector<2x32xf32>
    %90 = arith.addf %88, %89 : vector<2x32xf32>
    %91 = math.tanh %90 : vector<2x32xf32>
    %92 = arith.mulf %85, %91 : vector<2x32xf32>
    %93 = vector.extract_strided_slice %6 {offsets = [6, 0], sizes = [2, 128], strides = [1, 1]} : vector<16x128xf32> to vector<2x128xf32>
    %cst_33 = arith.constant dense<0.000000e+00> : vector<2x128xf32>
    %94 = tpu.matmul %92, %0, %cst_33 {dimension_numbers = #tpu.dot_dimension_numbers<[1], [0], [0], [1], [0, 0, 1, 1], [], []>} : vector<2x32xf32>, vector<32x128xf32>, vector<2x128xf32> -> vector<2x128xf32>
    %95 = arith.addf %93, %94 : vector<2x128xf32>
    %cst_34 = arith.constant 5.000000e-01 : f32
    %96 = vector.broadcast %cst_34 : f32 to vector<2x128xf32>
    %97 = arith.mulf %96, %95 : vector<2x128xf32>
    %98 = math.tanh %97 : vector<2x128xf32>
    %99 = vector.extract_strided_slice %98 {offsets = [0, 0], sizes = [2, 32], strides = [1, 1]} : vector<2x128xf32> to vector<2x32xf32>
    %cst_35 = arith.constant 5.000000e-01 : f32
    %100 = vector.broadcast %cst_35 : f32 to vector<2x32xf32>
    %101 = arith.mulf %100, %99 : vector<2x32xf32>
    %cst_36 = arith.constant 5.000000e-01 : f32
    %102 = vector.broadcast %cst_36 : f32 to vector<2x32xf32>
    %103 = arith.addf %101, %102 : vector<2x32xf32>
    %104 = vector.extract_strided_slice %98 {offsets = [0, 32], sizes = [2, 32], strides = [1, 1]} : vector<2x128xf32> to vector<2x32xf32>
    %cst_37 = arith.constant 5.000000e-01 : f32
    %105 = vector.broadcast %cst_37 : f32 to vector<2x32xf32>
    %106 = arith.mulf %105, %104 : vector<2x32xf32>
    %cst_38 = arith.constant 5.000000e-01 : f32
    %107 = vector.broadcast %cst_38 : f32 to vector<2x32xf32>
    %108 = arith.addf %106, %107 : vector<2x32xf32>
    %109 = vector.extract_strided_slice %98 {offsets = [0, 96], sizes = [2, 32], strides = [1, 1]} : vector<2x128xf32> to vector<2x32xf32>
    %cst_39 = arith.constant 5.000000e-01 : f32
    %110 = vector.broadcast %cst_39 : f32 to vector<2x32xf32>
    %111 = arith.mulf %110, %109 : vector<2x32xf32>
    %cst_40 = arith.constant 5.000000e-01 : f32
    %112 = vector.broadcast %cst_40 : f32 to vector<2x32xf32>
    %113 = arith.addf %111, %112 : vector<2x32xf32>
    %114 = vector.extract_strided_slice %95 {offsets = [0, 64], sizes = [2, 32], strides = [1, 1]} : vector<2x128xf32> to vector<2x32xf32>
    %115 = math.tanh %114 : vector<2x32xf32>
    %116 = arith.mulf %108, %90 : vector<2x32xf32>
    %117 = arith.mulf %103, %115 : vector<2x32xf32>
    %118 = arith.addf %116, %117 : vector<2x32xf32>
    %119 = math.tanh %118 : vector<2x32xf32>
    %120 = arith.mulf %113, %119 : vector<2x32xf32>
    %121 = vector.extract_strided_slice %6 {offsets = [8, 0], sizes = [2, 128], strides = [1, 1]} : vector<16x128xf32> to vector<2x128xf32>
    %cst_41 = arith.constant dense<0.000000e+00> : vector<2x128xf32>
    %122 = tpu.matmul %120, %0, %cst_41 {dimension_numbers = #tpu.dot_dimension_numbers<[1], [0], [0], [1], [0, 0, 1, 1], [], []>} : vector<2x32xf32>, vector<32x128xf32>, vector<2x128xf32> -> vector<2x128xf32>
    %123 = arith.addf %121, %122 : vector<2x128xf32>
    %cst_42 = arith.constant 5.000000e-01 : f32
    %124 = vector.broadcast %cst_42 : f32 to vector<2x128xf32>
    %125 = arith.mulf %124, %123 : vector<2x128xf32>
    %126 = math.tanh %125 : vector<2x128xf32>
    %127 = vector.extract_strided_slice %126 {offsets = [0, 0], sizes = [2, 32], strides = [1, 1]} : vector<2x128xf32> to vector<2x32xf32>
    %cst_43 = arith.constant 5.000000e-01 : f32
    %128 = vector.broadcast %cst_43 : f32 to vector<2x32xf32>
    %129 = arith.mulf %128, %127 : vector<2x32xf32>
    %cst_44 = arith.constant 5.000000e-01 : f32
    %130 = vector.broadcast %cst_44 : f32 to vector<2x32xf32>
    %131 = arith.addf %129, %130 : vector<2x32xf32>
    %132 = vector.extract_strided_slice %126 {offsets = [0, 32], sizes = [2, 32], strides = [1, 1]} : vector<2x128xf32> to vector<2x32xf32>
    %cst_45 = arith.constant 5.000000e-01 : f32
    %133 = vector.broadcast %cst_45 : f32 to vector<2x32xf32>
    %134 = arith.mulf %133, %132 : vector<2x32xf32>
    %cst_46 = arith.constant 5.000000e-01 : f32
    %135 = vector.broadcast %cst_46 : f32 to vector<2x32xf32>
    %136 = arith.addf %134, %135 : vector<2x32xf32>
    %137 = vector.extract_strided_slice %126 {offsets = [0, 96], sizes = [2, 32], strides = [1, 1]} : vector<2x128xf32> to vector<2x32xf32>
    %cst_47 = arith.constant 5.000000e-01 : f32
    %138 = vector.broadcast %cst_47 : f32 to vector<2x32xf32>
    %139 = arith.mulf %138, %137 : vector<2x32xf32>
    %cst_48 = arith.constant 5.000000e-01 : f32
    %140 = vector.broadcast %cst_48 : f32 to vector<2x32xf32>
    %141 = arith.addf %139, %140 : vector<2x32xf32>
    %142 = vector.extract_strided_slice %123 {offsets = [0, 64], sizes = [2, 32], strides = [1, 1]} : vector<2x128xf32> to vector<2x32xf32>
    %143 = math.tanh %142 : vector<2x32xf32>
    %144 = arith.mulf %136, %118 : vector<2x32xf32>
    %145 = arith.mulf %131, %143 : vector<2x32xf32>
    %146 = arith.addf %144, %145 : vector<2x32xf32>
    %147 = math.tanh %146 : vector<2x32xf32>
    %148 = arith.mulf %141, %147 : vector<2x32xf32>
    %149 = vector.extract_strided_slice %6 {offsets = [10, 0], sizes = [2, 128], strides = [1, 1]} : vector<16x128xf32> to vector<2x128xf32>
    %cst_49 = arith.constant dense<0.000000e+00> : vector<2x128xf32>
    %150 = tpu.matmul %148, %0, %cst_49 {dimension_numbers = #tpu.dot_dimension_numbers<[1], [0], [0], [1], [0, 0, 1, 1], [], []>} : vector<2x32xf32>, vector<32x128xf32>, vector<2x128xf32> -> vector<2x128xf32>
    %151 = arith.addf %149, %150 : vector<2x128xf32>
    %cst_50 = arith.constant 5.000000e-01 : f32
    %152 = vector.broadcast %cst_50 : f32 to vector<2x128xf32>
    %153 = arith.mulf %152, %151 : vector<2x128xf32>
    %154 = math.tanh %153 : vector<2x128xf32>
    %155 = vector.extract_strided_slice %154 {offsets = [0, 0], sizes = [2, 32], strides = [1, 1]} : vector<2x128xf32> to vector<2x32xf32>
    %cst_51 = arith.constant 5.000000e-01 : f32
    %156 = vector.broadcast %cst_51 : f32 to vector<2x32xf32>
    %157 = arith.mulf %156, %155 : vector<2x32xf32>
    %cst_52 = arith.constant 5.000000e-01 : f32
    %158 = vector.broadcast %cst_52 : f32 to vector<2x32xf32>
    %159 = arith.addf %157, %158 : vector<2x32xf32>
    %160 = vector.extract_strided_slice %154 {offsets = [0, 32], sizes = [2, 32], strides = [1, 1]} : vector<2x128xf32> to vector<2x32xf32>
    %cst_53 = arith.constant 5.000000e-01 : f32
    %161 = vector.broadcast %cst_53 : f32 to vector<2x32xf32>
    %162 = arith.mulf %161, %160 : vector<2x32xf32>
    %cst_54 = arith.constant 5.000000e-01 : f32
    %163 = vector.broadcast %cst_54 : f32 to vector<2x32xf32>
    %164 = arith.addf %162, %163 : vector<2x32xf32>
    %165 = vector.extract_strided_slice %154 {offsets = [0, 96], sizes = [2, 32], strides = [1, 1]} : vector<2x128xf32> to vector<2x32xf32>
    %cst_55 = arith.constant 5.000000e-01 : f32
    %166 = vector.broadcast %cst_55 : f32 to vector<2x32xf32>
    %167 = arith.mulf %166, %165 : vector<2x32xf32>
    %cst_56 = arith.constant 5.000000e-01 : f32
    %168 = vector.broadcast %cst_56 : f32 to vector<2x32xf32>
    %169 = arith.addf %167, %168 : vector<2x32xf32>
    %170 = vector.extract_strided_slice %151 {offsets = [0, 64], sizes = [2, 32], strides = [1, 1]} : vector<2x128xf32> to vector<2x32xf32>
    %171 = math.tanh %170 : vector<2x32xf32>
    %172 = arith.mulf %164, %146 : vector<2x32xf32>
    %173 = arith.mulf %159, %171 : vector<2x32xf32>
    %174 = arith.addf %172, %173 : vector<2x32xf32>
    %175 = math.tanh %174 : vector<2x32xf32>
    %176 = arith.mulf %169, %175 : vector<2x32xf32>
    %177 = vector.extract_strided_slice %6 {offsets = [12, 0], sizes = [2, 128], strides = [1, 1]} : vector<16x128xf32> to vector<2x128xf32>
    %cst_57 = arith.constant dense<0.000000e+00> : vector<2x128xf32>
    %178 = tpu.matmul %176, %0, %cst_57 {dimension_numbers = #tpu.dot_dimension_numbers<[1], [0], [0], [1], [0, 0, 1, 1], [], []>} : vector<2x32xf32>, vector<32x128xf32>, vector<2x128xf32> -> vector<2x128xf32>
    %179 = arith.addf %177, %178 : vector<2x128xf32>
    %cst_58 = arith.constant 5.000000e-01 : f32
    %180 = vector.broadcast %cst_58 : f32 to vector<2x128xf32>
    %181 = arith.mulf %180, %179 : vector<2x128xf32>
    %182 = math.tanh %181 : vector<2x128xf32>
    %183 = vector.extract_strided_slice %182 {offsets = [0, 0], sizes = [2, 32], strides = [1, 1]} : vector<2x128xf32> to vector<2x32xf32>
    %cst_59 = arith.constant 5.000000e-01 : f32
    %184 = vector.broadcast %cst_59 : f32 to vector<2x32xf32>
    %185 = arith.mulf %184, %183 : vector<2x32xf32>
    %cst_60 = arith.constant 5.000000e-01 : f32
    %186 = vector.broadcast %cst_60 : f32 to vector<2x32xf32>
    %187 = arith.addf %185, %186 : vector<2x32xf32>
    %188 = vector.extract_strided_slice %182 {offsets = [0, 32], sizes = [2, 32], strides = [1, 1]} : vector<2x128xf32> to vector<2x32xf32>
    %cst_61 = arith.constant 5.000000e-01 : f32
    %189 = vector.broadcast %cst_61 : f32 to vector<2x32xf32>
    %190 = arith.mulf %189, %188 : vector<2x32xf32>
    %cst_62 = arith.constant 5.000000e-01 : f32
    %191 = vector.broadcast %cst_62 : f32 to vector<2x32xf32>
    %192 = arith.addf %190, %191 : vector<2x32xf32>
    %193 = vector.extract_strided_slice %182 {offsets = [0, 96], sizes = [2, 32], strides = [1, 1]} : vector<2x128xf32> to vector<2x32xf32>
    %cst_63 = arith.constant 5.000000e-01 : f32
    %194 = vector.broadcast %cst_63 : f32 to vector<2x32xf32>
    %195 = arith.mulf %194, %193 : vector<2x32xf32>
    %cst_64 = arith.constant 5.000000e-01 : f32
    %196 = vector.broadcast %cst_64 : f32 to vector<2x32xf32>
    %197 = arith.addf %195, %196 : vector<2x32xf32>
    %198 = vector.extract_strided_slice %179 {offsets = [0, 64], sizes = [2, 32], strides = [1, 1]} : vector<2x128xf32> to vector<2x32xf32>
    %199 = math.tanh %198 : vector<2x32xf32>
    %200 = arith.mulf %192, %174 : vector<2x32xf32>
    %201 = arith.mulf %187, %199 : vector<2x32xf32>
    %202 = arith.addf %200, %201 : vector<2x32xf32>
    %203 = math.tanh %202 : vector<2x32xf32>
    %204 = arith.mulf %197, %203 : vector<2x32xf32>
    %205 = vector.extract_strided_slice %6 {offsets = [14, 0], sizes = [2, 128], strides = [1, 1]} : vector<16x128xf32> to vector<2x128xf32>
    %cst_65 = arith.constant dense<0.000000e+00> : vector<2x128xf32>
    %206 = tpu.matmul %204, %0, %cst_65 {dimension_numbers = #tpu.dot_dimension_numbers<[1], [0], [0], [1], [0, 0, 1, 1], [], []>} : vector<2x32xf32>, vector<32x128xf32>, vector<2x128xf32> -> vector<2x128xf32>
    %207 = arith.addf %205, %206 : vector<2x128xf32>
    %cst_66 = arith.constant 5.000000e-01 : f32
    %208 = vector.broadcast %cst_66 : f32 to vector<2x128xf32>
    %209 = arith.mulf %208, %207 : vector<2x128xf32>
    %210 = math.tanh %209 : vector<2x128xf32>
    %211 = vector.extract_strided_slice %210 {offsets = [0, 0], sizes = [2, 32], strides = [1, 1]} : vector<2x128xf32> to vector<2x32xf32>
    %cst_67 = arith.constant 5.000000e-01 : f32
    %212 = vector.broadcast %cst_67 : f32 to vector<2x32xf32>
    %213 = arith.mulf %212, %211 : vector<2x32xf32>
    %cst_68 = arith.constant 5.000000e-01 : f32
    %214 = vector.broadcast %cst_68 : f32 to vector<2x32xf32>
    %215 = arith.addf %213, %214 : vector<2x32xf32>
    %216 = vector.extract_strided_slice %210 {offsets = [0, 32], sizes = [2, 32], strides = [1, 1]} : vector<2x128xf32> to vector<2x32xf32>
    %cst_69 = arith.constant 5.000000e-01 : f32
    %217 = vector.broadcast %cst_69 : f32 to vector<2x32xf32>
    %218 = arith.mulf %217, %216 : vector<2x32xf32>
    %cst_70 = arith.constant 5.000000e-01 : f32
    %219 = vector.broadcast %cst_70 : f32 to vector<2x32xf32>
    %220 = arith.addf %218, %219 : vector<2x32xf32>
    %221 = vector.extract_strided_slice %210 {offsets = [0, 96], sizes = [2, 32], strides = [1, 1]} : vector<2x128xf32> to vector<2x32xf32>
    %cst_71 = arith.constant 5.000000e-01 : f32
    %222 = vector.broadcast %cst_71 : f32 to vector<2x32xf32>
    %223 = arith.mulf %222, %221 : vector<2x32xf32>
    %cst_72 = arith.constant 5.000000e-01 : f32
    %224 = vector.broadcast %cst_72 : f32 to vector<2x32xf32>
    %225 = arith.addf %223, %224 : vector<2x32xf32>
    %226 = vector.extract_strided_slice %207 {offsets = [0, 64], sizes = [2, 32], strides = [1, 1]} : vector<2x128xf32> to vector<2x32xf32>
    %227 = math.tanh %226 : vector<2x32xf32>
    %228 = arith.mulf %220, %202 : vector<2x32xf32>
    %229 = arith.mulf %215, %227 : vector<2x32xf32>
    %230 = arith.addf %228, %229 : vector<2x32xf32>
    %231 = math.tanh %230 : vector<2x32xf32>
    %232 = arith.mulf %225, %231 : vector<2x32xf32>
    %233 = tpu.concatenate %36, %64, %92, %120, %148, %176, %204, %232 in 0 : vector<2x32xf32>, vector<2x32xf32>, vector<2x32xf32>, vector<2x32xf32>, vector<2x32xf32>, vector<2x32xf32>, vector<2x32xf32>, vector<2x32xf32> -> vector<16x32xf32>
    %c0_73 = arith.constant 0 : index
    %c0_74 = arith.constant 0 : index
    %234 = vector.load %arg5[%c0_73, %c0_74] : memref<32x64xf32, #tpu.memory_space<vmem>>, vector<32x64xf32>
    %cst_75 = arith.constant dense<0.000000e+00> : vector<16x64xf32>
    %235 = tpu.matmul %233, %234, %cst_75 {dimension_numbers = #tpu.dot_dimension_numbers<[1], [0], [0], [1], [0, 0, 1, 1], [], []>} : vector<16x32xf32>, vector<32x64xf32>, vector<16x64xf32> -> vector<16x64xf32>
    %c0_76 = arith.constant 0 : index
    %c0_77 = arith.constant 0 : index
    %236 = vector.load %arg6[%c0_76, %c0_77] : memref<1x64xf32, #tpu.memory_space<vmem>>, vector<1x64xf32>
    %237 = vector.broadcast %236 : vector<1x64xf32> to vector<16x64xf32>
    %238 = arith.addf %235, %237 : vector<16x64xf32>
    %239 = math.tanh %238 : vector<16x64xf32>
    %c0_78 = arith.constant 0 : index
    %c0_79 = arith.constant 0 : index
    %240 = vector.load %arg7[%c0_78, %c0_79] : memref<64x48xf32, #tpu.memory_space<vmem>>, vector<64x48xf32>
    %cst_80 = arith.constant dense<0.000000e+00> : vector<16x48xf32>
    %241 = tpu.matmul %239, %240, %cst_80 {dimension_numbers = #tpu.dot_dimension_numbers<[1], [0], [0], [1], [0, 0, 1, 1], [], []>} : vector<16x64xf32>, vector<64x48xf32>, vector<16x48xf32> -> vector<16x48xf32>
    %c0_81 = arith.constant 0 : index
    %c0_82 = arith.constant 0 : index
    %242 = vector.load %arg8[%c0_81, %c0_82] : memref<1x48xf32, #tpu.memory_space<vmem>>, vector<1x48xf32>
    %243 = vector.broadcast %242 : vector<1x48xf32> to vector<16x48xf32>
    %244 = arith.addf %241, %243 : vector<16x48xf32>
    %245 = math.tanh %244 : vector<16x48xf32>
    %c0_83 = arith.constant 0 : index
    %c0_84 = arith.constant 0 : index
    %246 = vector.load %arg9[%c0_83, %c0_84] : memref<48x128xf32, #tpu.memory_space<vmem>>, vector<48x128xf32>
    %cst_85 = arith.constant dense<0.000000e+00> : vector<16x128xf32>
    %247 = tpu.matmul %245, %246, %cst_85 {dimension_numbers = #tpu.dot_dimension_numbers<[1], [0], [0], [1], [0, 0, 1, 1], [], []>} : vector<16x48xf32>, vector<48x128xf32>, vector<16x128xf32> -> vector<16x128xf32>
    %c0_86 = arith.constant 0 : index
    %c0_87 = arith.constant 0 : index
    %248 = vector.load %arg10[%c0_86, %c0_87] : memref<1x128xf32, #tpu.memory_space<vmem>>, vector<1x128xf32>
    %249 = vector.broadcast %248 : vector<1x128xf32> to vector<16x128xf32>
    %250 = arith.addf %247, %249 : vector<16x128xf32>
    %251 = math.exp %250 : vector<16x128xf32>
    %cst_88 = arith.constant dense<0.000000e+00> : vector<16xf32>
    %252 = vector.multi_reduction <add>, %251, %cst_88 [1] : vector<16x128xf32> to vector<16xf32>
    %253 = vector.shape_cast %252 : vector<16xf32> to vector<16x1xf32>
    %254 = vector.broadcast %253 : vector<16x1xf32> to vector<16x128xf32>
    %255 = arith.divf %251, %254 : vector<16x128xf32>
    %c0_89 = arith.constant 0 : index
    %c0_90 = arith.constant 0 : index
    %256 = vector.load %arg11[%c0_89, %c0_90] : memref<16x128xf32, #tpu.memory_space<vmem>>, vector<16x128xf32>
    tpu.vector_store %arg11[%c0_89, %c0_90], %255 {strides = array<i32>} : memref<16x128xf32, #tpu.memory_space<vmem>>, vector<16x128xf32>,
    return
  }
  func.func @transform_0(%arg0: i32) -> (i32, i32) {
    %c0_i32 = arith.constant 0 : i32
    %c0_i32_0 = arith.constant 0 : i32
    %c0_i32_1 = arith.constant 0 : i32
    return %c0_i32, %c0_i32_0 : i32, i32
  }
  func.func @transform_1(%arg0: i32) -> (i32, i32) {
    %c0_i32 = arith.constant 0 : i32
    %c0_i32_0 = arith.constant 0 : i32
    %c0_i32_1 = arith.constant 0 : i32
    return %c0_i32, %c0_i32_0 : i32, i32
  }
  func.func @transform_2(%arg0: i32) -> (i32, i32) {
    %c0_i32 = arith.constant 0 : i32
    %c0_i32_0 = arith.constant 0 : i32
    %c0_i32_1 = arith.constant 0 : i32
    return %c0_i32, %c0_i32_0 : i32, i32
  }
  func.func @transform_3(%arg0: i32) -> (i32, i32) {
    %c0_i32 = arith.constant 0 : i32
    %c0_i32_0 = arith.constant 0 : i32
    %c0_i32_1 = arith.constant 0 : i32
    return %c0_i32, %c0_i32_0 : i32, i32
  }
  func.func @transform_4(%arg0: i32) -> (i32, i32) {
    %c0_i32 = arith.constant 0 : i32
    %c0_i32_0 = arith.constant 0 : i32
    %c0_i32_1 = arith.constant 0 : i32
    return %c0_i32, %c0_i32_0 : i32, i32
  }
  func.func @transform_5(%arg0: i32) -> (i32, i32) {
    %c0_i32 = arith.constant 0 : i32
    %c0_i32_0 = arith.constant 0 : i32
    %c0_i32_1 = arith.constant 0 : i32
    return %c0_i32, %c0_i32_0 : i32, i32
  }
  func.func @transform_6(%arg0: i32) -> (i32, i32) {
    %c0_i32 = arith.constant 0 : i32
    %c0_i32_0 = arith.constant 0 : i32
    %c0_i32_1 = arith.constant 0 : i32
    return %c0_i32, %c0_i32_0 : i32, i32
  }
  func.func @transform_7(%arg0: i32) -> (i32, i32) {
    %c0_i32 = arith.constant 0 : i32
    %c0_i32_0 = arith.constant 0 : i32
    %c0_i32_1 = arith.constant 0 : i32
    return %c0_i32, %c0_i32_0 : i32, i32
  }
  func.func @transform_8(%arg0: i32) -> (i32, i32) {
    %c0_i32 = arith.constant 0 : i32
    %c0_i32_0 = arith.constant 0 : i32
    %c0_i32_1 = arith.constant 0 : i32
    return %c0_i32, %c0_i32_0 : i32, i32
  }
  func.func @transform_9(%arg0: i32) -> (i32, i32) {
    %c0_i32 = arith.constant 0 : i32
    %c0_i32_0 = arith.constant 0 : i32
    %c0_i32_1 = arith.constant 0 : i32
    return %c0_i32, %c0_i32_0 : i32, i32
  }
  func.func @transform_10(%arg0: i32) -> (i32, i32) {
    %c0_i32 = arith.constant 0 : i32
    %c0_i32_0 = arith.constant 0 : i32
    %c0_i32_1 = arith.constant 0 : i32
    return %c0_i32, %c0_i32_0 : i32, i32
  }
}

</mosaic_0001>

<bundles_post_ra>
// kernel: tpu_custom_call.1
= control target key start
LH: loop header
LB: loop body
LE: loop exit
PB: predicated region body
PF: predicated region fallthrough
CT: control target
= control target key end

     0   :  { %15 = vsyncpa [#allocation3], 0  ;;  %s2092_s0 = inlined_call_operand.hbm [shape: f32[16,16], index: 0, kind: input, shape index: {}]   ;;  %s2093_s1 = inlined_call_operand.hbm [shape: f32[16,128], index: 1, kind: input, shape index: {}]   ;;  %s2094_s2 = inlined_call_operand.vmem [shape: f32[32,128], index: 2, kind: input, shape index: {}]   ;;  %s2095_s3 = inlined_call_operand.vmem [shape: f32[1,128], index: 3, kind: input, shape index: {}]   ;;  %s2096_s4 = inlined_call_operand.vmem [shape: f32[32,64], index: 4, kind: input, shape index: {}]   ;;  %s2097_s5 = inlined_call_operand.vmem [shape: f32[1,64], index: 5, kind: input, shape index: {}]   ;;  %s2098_s6 = inlined_call_operand.vmem [shape: f32[64,48], index: 6, kind: input, shape index: {}]   ;;  %s2099_s7 = inlined_call_operand.vmem [shape: f32[1,48], index: 7, kind: input, shape index: {}]   ;;  %s2100_s8 = inlined_call_operand.vmem [shape: f32[48,128], index: 8, kind: input, shape index: {}]   ;;  %s2101_s9 = inlined_call_operand.vmem [shape: f32[1,128], index: 9, kind: input, shape index: {}]   ;;  %s2102_s10 = inlined_call_operand.hbm [shape: f32[16,128], index: 10, kind: output, shape index: {}]  }
   0x1   :  { %16 = vsyncpa [#allocation6], 0 }
   0x2   :  { %17 = vsyncpa [#allocation4], 0  ;;  %s1782_s13 = smov [#allocation2]   ;;  %s1710_s17 = scalar_lea.hbm %s2092_s0, 256 }
   0x3   :  { %s23_s14 = sshll.u32 %s1782_s13, 4  ;;  %p1711_p0 = scmp.ne.s32.totalorder %s2092_s0, %s1710_s17  ;;  %s24_s14 = int_to_ptr.vmem [resolvable:$true] %s23_s14 }
   0x4   :  { %p1714_p1 = scmp.lt.u32.totalorder %s1710_s17, %s2092_s0 }
   0x6   :  { %p1716_p2 = pnand %p1714_p1, %p1711_p0 }
   0x8   :  { %1719 = shalt.err (!%p1716_p2)
}
   0x9   :  { %s1720_s22 = scalar_lea.vmem %s24_s14, 256  ;;  %p1725_p4 = scmp.lt.s32.totalorder %s24_s14, %s24_s14 }
   0xa   :  { %p1721_p3 = scmp.ne.s32.totalorder %s24_s14, %s1720_s22  ;;  %p1726_p5 = scmp.lt.s32.totalorder %s1720_s22, %s1720_s22 }
   0xc   :  { %p1727_p6 = por %p1726_p5, %p1725_p4 }
   0xe   :  { %p1728_p7 = pnand %p1727_p6, %p1721_p3 }
  0x10   :  { %1731 = shalt.err (!%p1728_p7)
}
  0x11   :  { %s1783_s23 = smov 128   ;;  %s1784_s24 = smov 8  }
  0x12   :  { %29 = dma.hbm_to_vmem [thread:$0]  %s2092_s0, 256, %s24_s14, [#allocation3], %s1783_s23, %s1783_s23, %s1784_s24  }
  0x13   :  { %s1785_s27 = smov [#allocation5]   ;;  %s1732_s11 = scalar_lea.hbm %s2093_s1, 256 }
  0x14   :  { %s35_s28 = sshll.u32 %s1785_s27, 4  ;;  %p1733_p8 = scmp.ne.s32.totalorder %s2093_s1, %s1732_s11  ;;  %s36_s28 = int_to_ptr.vmem [resolvable:$true] %s35_s28 }
  0x15   :  { %p1736_p9 = scmp.lt.u32.totalorder %s1732_s11, %s2093_s1 }
  0x17   :  { %p1738_p10 = pnand %p1736_p9, %p1733_p8 }
  0x19   :  { %1741 = shalt.err (!%p1738_p10)
}
  0x1a   :  { %s1742_s17 = scalar_lea.vmem %s36_s28, 256  ;;  %p1747_p12 = scmp.lt.s32.totalorder %s36_s28, %s36_s28 }
  0x1b   :  { %p1743_p11 = scmp.ne.s32.totalorder %s36_s28, %s1742_s17  ;;  %p1748_p13 = scmp.lt.s32.totalorder %s1742_s17, %s1742_s17 }
  0x1d   :  { %p1749_p0 = por %p1748_p13, %p1747_p12 }
  0x1f   :  { %p1750_p1 = pnand %p1749_p0, %p1743_p11 }
  0x21   :  { %1753 = shalt.err (!%p1750_p1)
}
  0x22   :  { %41 = dma.hbm_to_vmem [thread:$0]  %s2093_s1, 256, %s36_s28, [#allocation6], %s1783_s23, %s1783_s23, %s1784_s24  }
  0x23   :  { %1776 = dma.done.wait [#allocation3], 256  }
  0x24   :  { %1777 = vsyncadd [#allocation3], 4294967040 }
  0x25   :  { %1778 = dma.done.wait [#allocation6], 256  }
  0x26   :  { %1779 = vsyncadd [#allocation6], 4294967040  ;;  %v1786_v0 = vmov 0.0|0.0   ;;  %vm1787_vm0 = vmmov 0   ;;  %v1788_v1 = vmov 0.0   ;;  %vm79_vm1 = vcmask 130048  }
  0x27   :  { %1552 = vmatprep.subr.bf16.mxu1 %v1786_v0  ;;  %1423 = vmatprep.mubr.msk.f32.mxu1 %vm1787_vm0, %v1788_v1  ;;  %v70_v2 = vld [vmem:[#allocation5] sm:$0xff]  ;;  %v71_v3 = vld [vmem:[#allocation5 + $0x8] sm:$0xff]  ;;  %v64_v4 = vld [vmem:[%s2094_s2] sm:$0xff]  ;;  %s1789_s28 = smov 64   ;;  %vm161_vm2 = vcmask 261120   ;;  %vm988_vm3 = vcmask 1041408  }
  0x28   :  { %v1548_v5 = vpack.c.bf16 %v71_v3, %v70_v2  ;;  %v65_v6 = vld [vmem:[%s2094_s2 + $0x8] sm:$0xff]  ;;  %v68_v7 = vld [vmem:[#allocation2] sm:$0xff]  ;;  %v66_v9 = vld [vmem:[%s2094_s2 + $0x10] sm:$0xff]  ;;  %vm990_vm4 = vcmask 1043456   ;;  %vm992_vm5 = vcmask 1045504   ;;  %vm1110_vm6 = vcmask 523264  }
  0x29   :  { %v1886_v8 = vpack.c.bf16 %v65_v6, %v64_v4  ;;  %1412 = vmatprep.mubr.msk.f32.mxu0 %vm79_vm1, %v68_v7  ;;  %v67_v10 = vld [vmem:[%s2094_s2 + $0x18] sm:$0xff]  ;;  %v69_v11 = vld [vmem:[#allocation2 + $0x8] sm:$0xff]  ;;  %v1321_v13 = vld [vmem:[%s2095_s3] ss:$0 sm:$0xff]  ;;  %s1790_s3 = smov 32   ;;  %vm1207_vm7 = vcmask 392192  }
  0x2a   :  { %1549 = vmatprep.subr.bf16.mxu0 %v1548_v5  ;;  %v1896_v12 = vpack.c.bf16 %v67_v10, %v66_v9 }
  0x2b   :  { %1554 = vmatpush3.bf16.msra.mxu1 %v1886_v8  ;;  %1551 = vmatpush3.bf16.msra.mxu0 %v1548_v5 }
  0x2c   :  { %1555 = vmatprep.subr.bf16.mxu1 %v1786_v0  ;;  %1558 = vmatprep.subr.bf16.mxu0 %v1786_v0 }
  0x2e   :  { %1413 = vmatmul.mubr.msk.f32.vlgmr.msra.gmra.mrb[0].mxu0 %vm79_vm1, %v69_v11 }
  0x2f   :  { %1557 = vmatpush3.bf16.msra.mxu1 %v1896_v12  ;;  %1560 = vmatpush3.bf16.msra.mxu0 %v1886_v8 }
  0x30   :  { %1561 = vmatprep.subr.bf16.mxu0 %v1786_v0  ;;  %1434 = vmatprep.mubr.msk.f32.mxu0 %vm1787_vm0, %v1788_v1 }
  0x31   :  { %1564 = vmatprep.subr.bf16.mxu1 %v1786_v0 }
  0x32   :  { %1424 = vmatmul.mubr.f32.vlgmr.msra.gmra.mrb[0].mxu1 %v1788_v1 }
  0x33   :  { %1563 = vmatpush3.bf16.msra.mxu0 %v1896_v12  ;;  %1566 = vmatpush3.bf16.msra.mxu1 %v1886_v8 }
  0x34   :  { %1567 = vmatprep.subr.bf16.mxu1 %v1786_v0  ;;  %1445 = vmatprep.mubr.msk.f32.mxu1 %vm1787_vm0, %v1788_v1 }
  0x35   :  { %1570 = vmatprep.subr.bf16.mxu0 %v1786_v0 }
  0x37   :  { %1569 = vmatpush3.bf16.msra.mxu1 %v1896_v12 }
  0x38   :  { %1576 = vmatprep.subr.bf16.mxu1 %v1786_v0 }
 0x101   :  { %v1414_v14 = vpop.f32.mrb[0].mxu0 }
 0x102   :  { %v1919_v15 = vadd.f32 %v1414_v14, %v1321_v13  ;;  %v152_v16 = vpop.f32.mrb[1].mxu0 }
 0x103   :  { %v1921_v17 = vadd.f32 %v1321_v13, %v152_v16 }
 0x105   :  { %v231_v18 = vpop.f32.mrb[0].mxu1 }
 0x106   :  { %v235_v19 = vadd.f32 %v231_v18, %v1921_v17  ;;  %v1425_v20 = vpop.f32.mrb[1].mxu1 }
 0x108   :  { %1646 = vtanh.f32 %v235_v19  ;;  %v236_v22 = vmul.f32 0.5, %v235_v19 }
 0x10a   :  { %1648 = vtanh.f32 %v236_v22 }
 0x112   :  { %v1647_v21 = vpop.eup %1646 }
 0x113   :  { %243 = vrot.lane.b32.xlu0 %v1647_v21, %s1789_s28 }
 0x114   :  { %v1649_v23 = vpop.eup %1648 }
 0x115   :  { %v238_v24 = vmul.f32 0.5, %v1649_v23 }
 0x117   :  { %v239_v25 = vadd.f32 0.5, %v238_v24 }
 0x119   :  { %v241_v28 = vmul.f32 0.0, %v239_v25 }
 0x185   :  { %v244_v26 = vpop.permute.xlu0 %243 }
 0x186   :  { %v246_v27 = vmul.f32 %v244_v26, %v239_v25 }
 0x188   :  { %248 = vrot.lane.b32.xlu0 %v246_v27, %s1790_s3 }
 0x1fa   :  { %v249_v29 = vpop.permute.xlu0 %248 }
 0x1fb   :  { %v251_v30 = vadd.f32 %v249_v29, %v241_v28 }
 0x1fd   :  { %1650 = vtanh.f32 %v251_v30  ;;  %v343_v46 = vrot.slane %v251_v30, 6 }
 0x207   :  { %v1651_v31 = vpop.eup %1650 }
 0x208   :  { %254 = vrot.lane.b32.xlu1 %v1651_v31, %s1789_s28 }
 0x27a   :  { %v255_v32 = vpop.permute.xlu1 %254 }
 0x27b   :  { %v1927_v33 = vmul.f32 %v255_v32, %v239_v25 }
 0x27d   :  { %259 = vrot.lane.b32.xlu1 %v1927_v33, %s1790_s3 }
 0x2ef   :  { %v260_v34 = vpop.permute.xlu1 %259 }
 0x2f0   :  { %1435 = vmatmul.mubr.msk.f32.vlgmr.msra.gmra.mrb[2].mxu0 %vm161_vm2, %v260_v34 }
 0x2f1   :  { %1572 = vmatpush3.bf16.msra.mxu0 %v1886_v8  ;;  %1456 = vmatprep.mubr.msk.f32.mxu0 %vm1787_vm0, %v1788_v1 }
 0x2f2   :  { %1573 = vmatprep.subr.bf16.mxu0 %v1786_v0 }
 0x2f5   :  { %1575 = vmatpush3.bf16.msra.mxu0 %v1896_v12 }
 0x2f6   :  { %1582 = vmatprep.subr.bf16.mxu0 %v1786_v0 }
 0x3c3   :  { %v329_v35 = vpop.f32.mrb[2].mxu0 }
 0x3c4   :  { %v334_v36 = vrot.slane %v329_v35, 6  ;;  %v1436_v37 = vpop.f32.mrb[3].mxu0 }
 0x3c6   :  { %v336_v38 = vadd.f32 %v334_v36, %v1921_v17 }
 0x3c8   :  { %1652 = vtanh.f32 %v336_v38  ;;  %v337_v40 = vmul.f32 0.5, %v336_v38 }
 0x3ca   :  { %1654 = vtanh.f32 %v337_v40 }
 0x3d2   :  { %v1653_v39 = vpop.eup %1652 }
 0x3d3   :  { %347 = vrot.lane.b32.xlu0 %v1653_v39, %s1789_s28 }
 0x3d4   :  { %v1655_v41 = vpop.eup %1654 }
 0x3d5   :  { %v339_v42 = vmul.f32 0.5, %v1655_v41 }
 0x3d7   :  { %v340_v43 = vadd.f32 0.5, %v339_v42 }
 0x3d9   :  { %v345_v47 = vmul.f32 %v343_v46, %v340_v43 }
 0x445   :  { %v348_v44 = vpop.permute.xlu0 %347 }
 0x446   :  { %v350_v45 = vmul.f32 %v348_v44, %v340_v43 }
 0x448   :  { %352 = vrot.lane.b32.xlu1 %v350_v45, %s1790_s3 }
 0x4ba   :  { %v353_v48 = vpop.permute.xlu1 %352 }
 0x4bb   :  { %v355_v49 = vadd.f32 %v353_v48, %v345_v47 }
 0x4bd   :  { %1656 = vtanh.f32 %v355_v49  ;;  %v448_v4 = vrot.slane %v355_v49, 6 }
 0x4c7   :  { %v1657_v50 = vpop.eup %1656 }
 0x4c8   :  { %358 = vrot.lane.b32.xlu0 %v1657_v50, %s1789_s28 }
 0x53a   :  { %v359_v51 = vpop.permute.xlu0 %358 }
 0x53b   :  { %v361_v52 = vmul.f32 %v359_v51, %v340_v43 }
 0x53d   :  { %v363_v53 = vrot.slane %v361_v52, 2  ;;  %v989_v13 = vsel %vm988_vm3, %v1927_v33, %v361_v52 }
 0x53f   :  { %364 = vrot.lane.b32.xlu1 %v363_v53, %s1790_s3 }
 0x5b1   :  { %v365_v54 = vpop.permute.xlu1 %364 }
 0x5b2   :  { %1446 = vmatmul.mubr.msk.f32.vlgmr.msra.gmra.mrb[2].mxu1 %vm161_vm2, %v365_v54 }
 0x5b3   :  { %1578 = vmatpush3.bf16.msra.mxu1 %v1886_v8  ;;  %1467 = vmatprep.mubr.msk.f32.mxu1 %vm1787_vm0, %v1788_v1 }
 0x5b4   :  { %1579 = vmatprep.subr.bf16.mxu1 %v1786_v0 }
 0x5b7   :  { %1581 = vmatpush3.bf16.msra.mxu1 %v1896_v12 }
 0x5b8   :  { %1588 = vmatprep.subr.bf16.mxu1 %v1786_v0 }
 0x685   :  { %v434_v55 = vpop.f32.mrb[2].mxu1 }
 0x686   :  { %v439_v56 = vrot.slane %v434_v55, 4  ;;  %v1447_v57 = vpop.f32.mrb[3].mxu1 }
 0x688   :  { %v441_v58 = vadd.f32 %v439_v56, %v1921_v17 }
 0x68a   :  { %1658 = vtanh.f32 %v441_v58  ;;  %v442_v60 = vmul.f32 0.5, %v441_v58 }
 0x68c   :  { %1660 = vtanh.f32 %v442_v60 }
 0x694   :  { %v1659_v59 = vpop.eup %1658 }
 0x695   :  { %452 = vrot.lane.b32.xlu0 %v1659_v59, %s1789_s28 }
 0x696   :  { %v1661_v61 = vpop.eup %1660 }
 0x697   :  { %v444_v62 = vmul.f32 0.5, %v1661_v61 }
 0x699   :  { %v445_v63 = vadd.f32 0.5, %v444_v62 }
 0x69b   :  { %v450_v5 = vmul.f32 %v448_v4, %v445_v63 }
 0x707   :  { %v453_v2 = vpop.permute.xlu0 %452 }
 0x708   :  { %v455_v3 = vmul.f32 %v453_v2, %v445_v63 }
 0x70a   :  { %457 = vrot.lane.b32.xlu1 %v455_v3, %s1790_s3 }
 0x77c   :  { %v458_v6 = vpop.permute.xlu1 %457 }
 0x77d   :  { %v460_v7 = vadd.f32 %v458_v6, %v450_v5 }
 0x77f   :  { %1662 = vtanh.f32 %v460_v7  ;;  %v553_v30 = vrot.slane %v460_v7, 6 }
 0x789   :  { %v1663_v9 = vpop.eup %1662 }
 0x78a   :  { %463 = vrot.lane.b32.xlu0 %v1663_v9, %s1789_s28 }
 0x7fc   :  { %v464_v10 = vpop.permute.xlu0 %463 }
 0x7fd   :  { %v466_v11 = vmul.f32 %v464_v10, %v445_v63 }
 0x7ff   :  { %v468_v14 = vrot.slane %v466_v11, 4  ;;  %v991_v16 = vsel %vm990_vm4, %v989_v13, %v466_v11 }
 0x801   :  { %469 = vrot.lane.b32.xlu1 %v468_v14, %s1790_s3 }
 0x873   :  { %v470_v18 = vpop.permute.xlu1 %469 }
 0x874   :  { %1457 = vmatmul.mubr.msk.f32.vlgmr.msra.gmra.mrb[4].mxu0 %vm161_vm2, %v470_v18 }
 0x875   :  { %1584 = vmatpush3.bf16.msra.mxu0 %v1886_v8  ;;  %1478 = vmatprep.mubr.msk.f32.mxu0 %vm1787_vm0, %v1788_v1 }
 0x876   :  { %1585 = vmatprep.subr.bf16.mxu0 %v1786_v0 }
 0x879   :  { %1587 = vmatpush3.bf16.msra.mxu0 %v1896_v12 }
 0x87a   :  { %1594 = vmatprep.subr.bf16.mxu0 %v1786_v0 }
 0x947   :  { %v539_v19 = vpop.f32.mrb[4].mxu0 }
 0x948   :  { %v544_v20 = vrot.slane %v539_v19, 2  ;;  %v1458_v21 = vpop.f32.mrb[5].mxu0 }
 0x94a   :  { %v546_v22 = vadd.f32 %v544_v20, %v1921_v17 }
 0x94c   :  { %1664 = vtanh.f32 %v546_v22  ;;  %v547_v24 = vmul.f32 0.5, %v546_v22 }
 0x94e   :  { %1666 = vtanh.f32 %v547_v24 }
 0x956   :  { %v1665_v23 = vpop.eup %1664 }
 0x957   :  { %557 = vrot.lane.b32.xlu0 %v1665_v23, %s1789_s28 }
 0x958   :  { %v1667_v25 = vpop.eup %1666 }
 0x959   :  { %v549_v26 = vmul.f32 0.5, %v1667_v25 }
 0x95b   :  { %v550_v27 = vadd.f32 0.5, %v549_v26 }
 0x95d   :  { %v555_v31 = vmul.f32 %v553_v30, %v550_v27 }
 0x9c9   :  { %v558_v28 = vpop.permute.xlu0 %557 }
 0x9ca   :  { %v560_v29 = vmul.f32 %v558_v28, %v550_v27 }
 0x9cc   :  { %562 = vrot.lane.b32.xlu1 %v560_v29, %s1790_s3 }
 0xa3e   :  { %v563_v32 = vpop.permute.xlu1 %562 }
 0xa3f   :  { %v565_v33 = vadd.f32 %v563_v32, %v555_v31 }
 0xa41   :  { %1668 = vtanh.f32 %v565_v33  ;;  %v655_v49 = vrot.slane %v565_v33, 6 }
 0xa4b   :  { %v1669_v34 = vpop.eup %1668 }
 0xa4c   :  { %568 = vrot.lane.b32.xlu0 %v1669_v34, %s1789_s28 }
 0xabe   :  { %v569_v17 = vpop.permute.xlu0 %568 }
 0xabf   :  { %v571_v35 = vmul.f32 %v569_v17, %v550_v27 }
 0xac1   :  { %v573_v36 = vrot.slane %v571_v35, 6  ;;  %v1970_v37 = vsel %vm992_vm5, %v991_v16, %v571_v35 }
 0xac3   :  { %574 = vrot.lane.b32.xlu1 %v573_v36, %s1790_s3 }
 0xb35   :  { %v575_v38 = vpop.permute.xlu1 %574 }
 0xb36   :  { %1468 = vmatmul.mubr.msk.f32.vlgmr.msra.gmra.mrb[4].mxu1 %vm161_vm2, %v575_v38 }
 0xb37   :  { %1590 = vmatpush3.bf16.msra.mxu1 %v1886_v8  ;;  %1489 = vmatprep.mubr.msk.f32.mxu1 %vm1787_vm0, %v1788_v1 }
 0xb38   :  { %1591 = vmatprep.subr.bf16.mxu1 %v1786_v0 }
 0xb3b   :  { %1593 = vmatpush3.bf16.msra.mxu1 %v1896_v12 }
 0xc09   :  { %v644_v39 = vpop.f32.mrb[4].mxu1 }
 0xc0a   :  { %v648_v40 = vadd.f32 %v644_v39, %v1919_v15  ;;  %v1469_v41 = vpop.f32.mrb[5].mxu1 }
 0xc0c   :  { %1670 = vtanh.f32 %v648_v40  ;;  %v649_v43 = vmul.f32 0.5, %v648_v40 }
 0xc0e   :  { %1672 = vtanh.f32 %v649_v43 }
 0xc16   :  { %v1671_v42 = vpop.eup %1670 }
 0xc17   :  { %659 = vrot.lane.b32.xlu0 %v1671_v42, %s1789_s28 }
 0xc18   :  { %v1673_v44 = vpop.eup %1672 }
 0xc19   :  { %v651_v45 = vmul.f32 0.5, %v1673_v44 }
 0xc1b   :  { %v652_v46 = vadd.f32 0.5, %v651_v45 }
 0xc1d   :  { %v657_v50 = vmul.f32 %v655_v49, %v652_v46 }
 0xc89   :  { %v660_v47 = vpop.permute.xlu0 %659 }
 0xc8a   :  { %v662_v48 = vmul.f32 %v660_v47, %v652_v46 }
 0xc8c   :  { %664 = vrot.lane.b32.xlu1 %v662_v48, %s1790_s3 }
 0xcfe   :  { %v665_v51 = vpop.permute.xlu1 %664 }
 0xcff   :  { %v667_v52 = vadd.f32 %v665_v51, %v657_v50 }
 0xd01   :  { %1674 = vtanh.f32 %v667_v52 }
 0xd0b   :  { %v1675_v53 = vpop.eup %1674 }
 0xd0c   :  { %670 = vrot.lane.b32.xlu0 %v1675_v53, %s1789_s28  ;;  %v998_v53 = vld [vmem:[%s2096_s4 + $0x8] sm:$0xff] }
 0xd7e   :  { %v671_v54 = vpop.permute.xlu0 %670 }
 0xd7f   :  { %v673_v55 = vmul.f32 %v671_v54, %v652_v46  ;;  %v999_v54 = vld [vmem:[%s2096_s4 + $0x10] sm:$0xff] }
 0xd81   :  { %675 = vrot.lane.b32.xlu1 %v673_v55, %s1790_s3 }
 0xdf3   :  { %v676_v56 = vpop.permute.xlu1 %675 }
 0xdf4   :  { %1479 = vmatmul.mubr.msk.f32.vlgmr.msra.gmra.mrb[6].mxu0 %vm161_vm2, %v676_v56 }
 0xdf5   :  { %1596 = vmatpush3.bf16.msra.mxu0 %v1886_v8  ;;  %1500 = vmatprep.mubr.msk.f32.mxu0 %vm1787_vm0, %v1788_v1 }
 0xdf6   :  { %1597 = vmatprep.subr.bf16.mxu0 %v1786_v0  ;;  %v759_v0 = vrot.slane %v667_v52, 6  ;;  %v997_v52 = vld [vmem:[%s2096_s4] sm:$0xff] }
 0xdf9   :  { %1599 = vmatpush3.bf16.msra.mxu0 %v1896_v12 }
 0xec7   :  { %v745_v57 = vpop.f32.mrb[6].mxu0 }
 0xec8   :  { %v750_v58 = vrot.slane %v745_v57, 6  ;;  %v1480_v59 = vpop.f32.mrb[7].mxu0 }
 0xeca   :  { %v752_v60 = vadd.f32 %v750_v58, %v1919_v15 }
 0xecc   :  { %1676 = vtanh.f32 %v752_v60  ;;  %v753_v62 = vmul.f32 0.5, %v752_v60 }
 0xece   :  { %1678 = vtanh.f32 %v753_v62  ;;  %v1095_v62 = vld [vmem:[%s2098_s6] sm:$0xff] }
 0xed6   :  { %v1677_v61 = vpop.eup %1676 }
 0xed7   :  { %763 = vrot.lane.b32.xlu0 %v1677_v61, %s1789_s28 }
 0xed8   :  { %v1679_v63 = vpop.eup %1678 }
 0xed9   :  { %v755_v8 = vmul.f32 0.5, %v1679_v63  ;;  %v1096_v63 = vld [vmem:[%s2098_s6 + $0x8] sm:$0xff] }
 0xedb   :  { %v756_v2 = vadd.f32 0.5, %v755_v8  ;;  %v1608_v8 = vpack.c.bf16 %v1096_v63, %v1095_v62 }
 0xedd   :  { %v761_v12 = vmul.f32 %v759_v0, %v756_v2  ;;  %1609 = vmatprep.subr.bf16.mxu0 %v1608_v8  ;;  %v1099_v0 = vld [vmem:[%s2098_s6 + $0x20] sm:$0xff] }
 0xf49   :  { %v764_v3 = vpop.permute.xlu0 %763 }
 0xf4a   :  { %v766_v1 = vmul.f32 %v764_v3, %v756_v2  ;;  %v1098_v3 = vld [vmem:[%s2098_s6 + $0x18] sm:$0xff] }
 0xf4c   :  { %768 = vrot.lane.b32.xlu1 %v766_v1, %s1790_s3 }
 0xfbe   :  { %v769_v4 = vpop.permute.xlu1 %768 }
 0xfbf   :  { %v771_v5 = vadd.f32 %v769_v4, %v761_v12  ;;  %v1100_v12 = vld [vmem:[%s2098_s6 + $0x28] sm:$0xff]  ;;  %v1101_v4 = vld [vmem:[%s2098_s6 + $0x30] sm:$0xff] }
 0xfc1   :  { %1680 = vtanh.f32 %v771_v5  ;;  %v864_v26 = vrot.slane %v771_v5, 6  ;;  %v1616_v5 = vpack.c.bf16 %v1100_v12, %v1099_v0 }
 0xfcb   :  { %v1681_v6 = vpop.eup %1680 }
 0xfcc   :  { %774 = vrot.lane.b32.xlu0 %v1681_v6, %s1789_s28  ;;  %v1102_v6 = vld [vmem:[%s2098_s6 + $0x38] sm:$0xff] }
0x103e   :  { %v775_v7 = vpop.permute.xlu0 %774 }
0x103f   :  { %v777_v9 = vmul.f32 %v775_v7, %v756_v2  ;;  %v1097_v2 = vld [vmem:[%s2098_s6 + $0x10] sm:$0xff]  ;;  %v1620_v7 = vpack.c.bf16 %v1102_v6, %v1101_v4 }
0x1040   :  { %v1612_v1 = vpack.c.bf16 %v1098_v3, %v1097_v2 }
0x1041   :  { %v779_v10 = vrot.slane %v777_v9, 2  ;;  %v994_v33 = vsel %vm988_vm3, %v673_v55, %v777_v9  ;;  %v1000_v55 = vld [vmem:[%s2096_s4 + $0x18] sm:$0xff]  ;;  %v1331_v9 = vld [vmem:[%s2097_s5] ss:$0 sm:$0xff] }
0x1042   :  { %v1604_v56 = vpack.c.bf16 %v1000_v55, %v999_v54 }
0x1043   :  { %780 = vrot.lane.b32.xlu1 %v779_v10, %s1790_s3 }
0x10b5   :  { %v781_v11 = vpop.permute.xlu1 %780 }
0x10b6   :  { %1490 = vmatmul.mubr.msk.f32.vlgmr.msra.gmra.mrb[6].mxu1 %vm161_vm2, %v781_v11 }
0x1189   :  { %v850_v13 = vpop.f32.mrb[6].mxu1 }
0x118a   :  { %v855_v14 = vrot.slane %v850_v13, 4  ;;  %v1491_v16 = vpop.f32.mrb[7].mxu1 }
0x118c   :  { %v857_v18 = vadd.f32 %v855_v14, %v1919_v15 }
0x118e   :  { %1682 = vtanh.f32 %v857_v18  ;;  %v858_v20 = vmul.f32 0.5, %v857_v18 }
0x1190   :  { %1684 = vtanh.f32 %v858_v20  ;;  %v1195_v20 = vld [vmem:[%s2100_s8 + $0x8] sm:$0xff] }
0x1198   :  { %v1683_v19 = vpop.eup %1682 }
0x1199   :  { %868 = vrot.lane.b32.xlu0 %v1683_v19, %s1789_s28  ;;  %v1194_v19 = vld [vmem:[%s2100_s8] sm:$0xff] }
0x119a   :  { %v1685_v21 = vpop.eup %1684 }
0x119b   :  { %v860_v22 = vmul.f32 0.5, %v1685_v21  ;;  %v1624_v21 = vpack.c.bf16 %v1195_v20, %v1194_v19 }
0x119d   :  { %v861_v23 = vadd.f32 0.5, %v860_v22  ;;  %v1196_v22 = vld [vmem:[%s2100_s8 + $0x10] sm:$0xff] }
0x119f   :  { %v866_v27 = vmul.f32 %v864_v26, %v861_v23  ;;  %v1199_v26 = vld [vmem:[%s2100_s8 + $0x28] sm:$0xff] }
0x120b   :  { %v869_v24 = vpop.permute.xlu0 %868 }
0x120c   :  { %v871_v25 = vmul.f32 %v869_v24, %v861_v23  ;;  %v1198_v24 = vld [vmem:[%s2100_s8 + $0x20] sm:$0xff] }
0x120e   :  { %873 = vrot.lane.b32.xlu1 %v871_v25, %s1790_s3 }
0x1280   :  { %v874_v28 = vpop.permute.xlu1 %873 }
0x1281   :  { %v876_v29 = vadd.f32 %v874_v28, %v866_v27  ;;  %v1632_v27 = vpack.c.bf16 %v1199_v26, %v1198_v24  ;;  %v1334_v28 = vld [vmem:[%s2099_s7] ss:$0 sm:$0xff]  ;;  %s1791_s7 = smov [#allocation7]  }
0x1282   :  { %s1308_s22 = sshll.u32 %s1791_s7, 4  ;;  %s1309_s22 = int_to_ptr.vmem [resolvable:$true] %s1308_s22 }
0x1283   :  { %1686 = vtanh.f32 %v876_v29  ;;  %v969_v48 = vrot.slane %v876_v29, 6  ;;  %p1759_p3 = scmp.lt.s32.totalorder %s1309_s22, %s1309_s22 }
0x128d   :  { %v1687_v30 = vpop.eup %1686 }
0x128e   :  { %879 = vrot.lane.b32.xlu0 %v1687_v30, %s1789_s28 }
0x1300   :  { %v880_v31 = vpop.permute.xlu0 %879 }
0x1301   :  { %v882_v32 = vmul.f32 %v880_v31, %v861_v23  ;;  %v1197_v23 = vld [vmem:[%s2100_s8 + $0x18] sm:$0xff] }
0x1302   :  { %v1628_v25 = vpack.c.bf16 %v1197_v23, %v1196_v22 }
0x1303   :  { %v884_v34 = vrot.slane %v882_v32, 4  ;;  %v995_v17 = vsel %vm990_vm4, %v994_v33, %v882_v32 }
0x1305   :  { %885 = vrot.lane.b32.xlu1 %v884_v34, %s1790_s3 }
0x1377   :  { %v886_v35 = vpop.permute.xlu1 %885 }
0x1378   :  { %1501 = vmatmul.mubr.msk.f32.vlgmr.msra.gmra.mrb[8].mxu0 %vm161_vm2, %v886_v35 }
0x1379   :  { %1611 = vmatpush3.bf16.msra.mxu0 %v1608_v8 }
0x137a   :  { %1613 = vmatprep.subr.bf16.mxu0 %v1612_v1 }
0x137d   :  { %1615 = vmatpush3.bf16.msra.mxu0 %v1612_v1 }
0x137e   :  { %1617 = vmatprep.subr.bf16.mxu0 %v1616_v5 }
0x1381   :  { %1619 = vmatpush3.bf16.msra.mxu0 %v1616_v5 }
0x1382   :  { %1621 = vmatprep.subr.bf16.mxu0 %v1620_v7 }
0x1385   :  { %1623 = vmatpush3.bf16.msra.mxu0 %v1620_v7 }
0x144b   :  { %v955_v36 = vpop.f32.mrb[8].mxu0 }
0x144c   :  { %v960_v38 = vrot.slane %v955_v36, 2  ;;  %v1502_v39 = vpop.f32.mrb[9].mxu0 }
0x144e   :  { %v962_v40 = vadd.f32 %v960_v38, %v1919_v15 }
0x1450   :  { %1688 = vtanh.f32 %v962_v40  ;;  %v963_v42 = vmul.f32 0.5, %v962_v40 }
0x1452   :  { %1690 = vtanh.f32 %v963_v42 }
0x145a   :  { %v1689_v41 = vpop.eup %1688 }
0x145b   :  { %973 = vrot.lane.b32.xlu0 %v1689_v41, %s1789_s28 }
0x145c   :  { %v1691_v43 = vpop.eup %1690 }
0x145d   :  { %v965_v44 = vmul.f32 0.5, %v1691_v43 }
0x145f   :  { %v966_v45 = vadd.f32 0.5, %v965_v44 }
0x1461   :  { %v971_v49 = vmul.f32 %v969_v48, %v966_v45 }
0x14cd   :  { %v974_v46 = vpop.permute.xlu0 %973 }
0x14ce   :  { %v976_v47 = vmul.f32 %v974_v46, %v966_v45 }
0x14d0   :  { %978 = vrot.lane.b32.xlu1 %v976_v47, %s1790_s3 }
0x14d4   :  { %1010 = vrot.lane.b32.xlu1 %v1970_v37, %s1790_s3  ;;  %v1600_v37 = vpack.c.bf16 %v998_v53, %v997_v52 }
0x14d6   :  { %1601 = vmatprep.subr.bf16.mxu1 %v1600_v37 }
0x14d7   :  { %1603 = vmatpush3.bf16.msra.mxu1 %v1600_v37 }
0x14d8   :  { %1605 = vmatprep.subr.bf16.mxu1 %v1604_v56 }
0x14db   :  { %1607 = vmatpush3.bf16.msra.mxu1 %v1604_v56 }
0x14dc   :  { %1625 = vmatprep.subr.bf16.mxu1 %v1624_v21 }
0x1542   :  { %v979_v50 = vpop.permute.xlu1 %978 }
0x1543   :  { %v981_v15 = vadd.f32 %v979_v50, %v971_v49 }
0x1545   :  { %1692 = vtanh.f32 %v981_v15 }
0x1546   :  { %v1011_v51 = vpop.permute.xlu1 %1010 }
0x1547   :  { %1511 = vmatprep.mubr.msk.f32.mxu1 %vm161_vm2, %v1011_v51 }
0x154f   :  { %v1693_v57 = vpop.eup %1692 }
0x1550   :  { %984 = vrot.lane.b32.xlu0 %v1693_v57, %s1789_s28 }
0x15c2   :  { %v985_v58 = vpop.permute.xlu0 %984 }
0x15c3   :  { %v987_v59 = vmul.f32 %v985_v58, %v966_v45 }
0x15c5   :  { %v996_v60 = vsel %vm992_vm5, %v995_v17, %v987_v59  ;;  %v1337_v17 = vld [vmem:[%s2101_s9] ss:$0 sm:$0xff]  ;;  %s1754_s9 = scalar_lea.vmem %s1309_s22, 256 }
0x15c6   :  { %1012 = vrot.lane.b32.xlu0 %v996_v60, %s1790_s3  ;;  %p1755_p2 = scmp.ne.s32.totalorder %s1309_s22, %s1754_s9  ;;  %p1760_p4 = scmp.lt.s32.totalorder %s1754_s9, %s1754_s9 }
0x15c8   :  { %p1761_p5 = por %p1760_p4, %p1759_p3 }
0x15ca   :  { %p1762_p6 = pnand %p1761_p5, %p1755_p2 }
0x1638   :  { %v1013_v61 = vpop.permute.xlu0 %1012 }
0x1639   :  { %1512 = vmatmul.mubr.msk.f32.vlgmr.msra.gmra.mrb[8].mxu1 %vm161_vm2, %v1013_v61 }
0x163a   :  { %1627 = vmatpush3.bf16.msra.mxu1 %v1624_v21 }
0x163b   :  { %1629 = vmatprep.subr.bf16.mxu1 %v1628_v25 }
0x163e   :  { %1631 = vmatpush3.bf16.msra.mxu1 %v1628_v25 }
0x163f   :  { %1633 = vmatprep.subr.bf16.mxu1 %v1632_v27 }
0x1642   :  { %1635 = vmatpush3.bf16.msra.mxu1 %v1632_v27 }
0x170c   :  { %v1513_v10 = vpop.f32.mrb[8].mxu1 }
0x170d   :  { %v1090_v11 = vadd.f32 %v1513_v10, %v1331_v9  ;;  %v1084_v13 = vpop.f32.mrb[9].mxu1 }
0x170e   :  { %v1085_v14 = vadd.f32 %v1331_v9, %v1084_v13 }
0x1710   :  { %1694 = vtanh.f32 %v1085_v14 }
0x1711   :  { %1696 = vtanh.f32 %v1090_v11 }
0x171a   :  { %v1695_v16 = vpop.eup %1694 }
0x171b   :  { %v1697_v18 = vpop.eup %1696  ;;  %1530 = vmatprep.mubr.msk.f32.mxu0 %vm1110_vm6, %v1695_v16 }
0x171c   :  { %1531 = vmatmul.mubr.msk.f32.vlgmr.msra.gmra.mrb[10].mxu0 %vm1110_vm6, %v1697_v18 }
0x17ef   :  { %v1532_v29 = vpop.f32.mrb[10].mxu0 }
0x17f0   :  { %v1189_v30 = vadd.f32 %v1532_v29, %v1334_v28  ;;  %v1183_v31 = vpop.f32.mrb[11].mxu0 }
0x17f1   :  { %v1184_v32 = vadd.f32 %v1334_v28, %v1183_v31 }
0x17f3   :  { %1698 = vtanh.f32 %v1184_v32 }
0x17f4   :  { %1700 = vtanh.f32 %v1189_v30 }
0x17fd   :  { %v1699_v33 = vpop.eup %1698 }
0x17fe   :  { %v1701_v34 = vpop.eup %1700  ;;  %1545 = vmatprep.mubr.msk.f32.mxu1 %vm1207_vm7, %v1699_v33 }
0x17ff   :  { %1546 = vmatmul.mubr.msk.f32.vlgmr.msra.gmra.mrb[10].mxu1 %vm1207_vm7, %v1701_v34 }
0x18d2   :  { %v1547_v35 = vpop.f32.mrb[10].mxu1 }
0x18d3   :  { %v1286_v36 = vadd.f32 %v1547_v35, %v1337_v17  ;;  %v1280_v38 = vpop.f32.mrb[11].mxu1 }
0x18d4   :  { %v1281_v39 = vadd.f32 %v1337_v17, %v1280_v38 }
0x18d5   :  { %v1291_v40 = vmul.f32 1.442695, %v1286_v36 }
0x18d6   :  { %v1289_v41 = vmul.f32 1.442695, %v1281_v39 }
0x18d7   :  { %1702 = vpow2.f32 %v1291_v40 }
0x18d8   :  { %1704 = vpow2.f32 %v1289_v41 }
0x18e1   :  { %v1703_v42 = vpop.eup %1702 }
0x18e2   :  { %v1705_v43 = vpop.eup %1704  ;;  %1295 = vadd.xlane.f32.xlu0 %v1703_v42 }
0x18e3   :  { %1293 = vadd.xlane.f32.xlu1 %v1705_v43 }
0x196f   :  { %v1296_v44 = vpop.xlane.xlu0 %1295 }
0x1970   :  { %1706 = vrcp.f32 %v1296_v44  ;;  %v1294_v45 = vpop.xlane.xlu1 %1293 }
0x1971   :  { %1708 = vrcp.f32 %v1294_v45 }
0x197a   :  { %v1707_v46 = vpop.eup %1706 }
0x197b   :  { %v1709_v47 = vpop.eup %1708  ;;  %v1300_v48 = vmul.f32 %v1707_v46, %v1703_v42 }
0x197c   :  { %v1298_v49 = vmul.f32 %v1709_v47, %v1705_v43 }
0x197d   :  { %1302 = vst [vmem:[#allocation7 + $0x8] sm:$0xff] %v1300_v48 }
0x197e   :  { %1301 = vst [vmem:[#allocation7] sm:$0xff] %v1298_v49 }
0x197f   :  { %1765 = shalt.err (!%p1762_p6)
}
0x1980   :  { %s1766_s2 = scalar_lea.hbm %s2102_s10, 256 }
0x1981   :  { %p1767_p7 = scmp.ne.s32.totalorder %s2102_s10, %s1766_s2  ;;  %p1770_p8 = scmp.lt.u32.totalorder %s1766_s2, %s2102_s10 }
0x1983   :  { %p1772_p9 = pnand %p1770_p8, %p1767_p7 }
0x1985   :  { %1775 = shalt.err (!%p1772_p9)
}
0x1986   :  { %1314 = dma.vmem_to_hbm [thread:$0]  %s1309_s22, 256, %s2102_s10, [#allocation4], %s1783_s23, %s1783_s23, %s1784_s24  }
0x1987   :  { %1780 = dma.done.wait [#allocation4], 256  }
0x1988   :  { %1781 = vsyncadd [#allocation4], 4294967040 }
0x1989   :  { %1318 = vsyncpa [#allocation3], 1 }
0x198a   :  { %1319 = vsyncpa [#allocation6], 1 }
0x198b   :  { %1320 = vsyncpa [#allocation4], 1 }

</bundles_post_ra>
